<compile_context>
chip_gen: v5e
topology: v5e:2x2
jax: 0.10.0
libtpu: 0.0.40
codegen_flags: <defaults>
</compile_context>

<pallas_src>
import functools

import jax
import jax.numpy as jnp
from jax import lax
from jax.experimental import pallas as pl
from jax.experimental.pallas import tpu as pltpu


# ---------------------------------------------------------------------------
# Kernels
# ---------------------------------------------------------------------------

def _conv1d_kernel_bias(x_ref, w_ref, b_ref, o_ref, acc_ref, *, precision):
    k = pl.program_id(2)
    prod = jnp.dot(
        x_ref[...], w_ref[...],
        preferred_element_type=jnp.float32, precision=precision,
    )

    @pl.when(k == 0)
    def _():
        acc_ref[...] = prod          # direct write: no zero store + reload

    @pl.when(k != 0)
    def _():
        acc_ref[...] += prod

    @pl.when(k == pl.num_programs(2) - 1)
    def _():
        o_ref[...] = (acc_ref[...] + b_ref[...]).astype(o_ref.dtype)


def _conv1d_kernel_nobias(x_ref, w_ref, o_ref, acc_ref, *, precision):
    k = pl.program_id(2)
    prod = jnp.dot(
        x_ref[...], w_ref[...],
        preferred_element_type=jnp.float32, precision=precision,
    )

    @pl.when(k == 0)
    def _():
        acc_ref[...] = prod

    @pl.when(k != 0)
    def _():
        acc_ref[...] += prod

    @pl.when(k == pl.num_programs(2) - 1)
    def _():
        o_ref[...] = acc_ref[...].astype(o_ref.dtype)


# ---------------------------------------------------------------------------
# Wrapper
# ---------------------------------------------------------------------------

def _cdiv(a, b):
    return (a + b - 1) // b


def _round_up(a, m):
    return _cdiv(a, m) * m


def _pick_tile(dim, tile_max, align):
    """Balanced tile: pick #blocks first, then the smallest aligned tile that
    covers the dim, so padding waste stays under one alignment unit/block."""
    dim_a = _round_up(max(dim, 1), align)
    if dim_a <= tile_max:
        return dim_a
    nblk = _cdiv(dim_a, tile_max)
    return _round_up(_cdiv(dim_a, nblk), align)


def conv1d(x, weight, bias=None, *, compute_dtype=jnp.bfloat16,
           tm=512, tn=1024, tk=1024):
    """x: (..., nx), weight: (nx, nf), bias: (nf,) or None -> (..., nf)."""
    nx, nf = weight.shape
    lead = x.shape[:-1]
    out_dtype = x.dtype

    x2 = x.reshape(-1, nx)
    M = x2.shape[0]

    compute_dtype = jnp.dtype(compute_dtype)
    cbytes = compute_dtype.itemsize
    obytes = jnp.dtype(out_dtype).itemsize

    # Sublane packing of the MXU input dtype: 8 rows f32, 16 bf16, 32 int8/fp8.
    align_m = 8 * (4 // cbytes)

    tm = _pick_tile(M, tm, align_m)
    tn = _pick_tile(nf, tn, 128)
    tk = _pick_tile(nx, tk, 128)     # keep K tiles large: protects the vst slot

    # Keep >=2 parallel output blocks so both v7x TensorCores (and megacore)
    # get work; decode-style small-M shapes shard along N instead of M.
    if _cdiv(M, tm) * _cdiv(nf, tn) < 2:
        nf_a = _round_up(nf, 128)
        if nf_a >= 256:
            tn = _round_up(_cdiv(nf_a, 2), 128)

    Mp = _round_up(M, tm)
    Np = _round_up(nf, tn)
    Kp = _round_up(nx, tk)

    # Cast to the MXU compute dtype before padding (half the pad/DMA bytes).
    x2 = x2.astype(compute_dtype)
    w2 = weight.astype(compute_dtype)
    if Mp != M or Kp != nx:
        x2 = jnp.pad(x2, ((0, Mp - M), (0, Kp - nx)))
    if Kp != nx or Np != nf:
        # No-op for 128-multiple transformer dims.  For ragged weights, pad &
        # cache the weight outside the hot path instead of paying this copy.
        w2 = jnp.pad(w2, ((0, Kp - nx), (0, Np - nf)))

    grid = (Mp // tm, Np // tn, Kp // tk)
    m_blocks, n_blocks, _ = grid

    # Explicit matmul precision: bf16 operands -> single MXU pass; f32
    # operands -> HIGHEST (multi-pass) so accuracy is never a silent default.
    precision = (lax.Precision.HIGHEST if compute_dtype == jnp.dtype(jnp.float32)
                 else lax.Precision.DEFAULT)

    x_spec = pl.BlockSpec((tm, tk), lambda i, j, k: (i, k))
    w_spec = pl.BlockSpec((tk, tn), lambda i, j, k: (k, j))
    o_spec = pl.BlockSpec((tm, tn), lambda i, j, k: (i, j))

    # Double-buffered x/w/out tiles + f32 accumulator (+ small bias row).
    footprint = (2 * tm * tk * cbytes + 2 * tk * tn * cbytes
                 + 2 * tm * tn * obytes + tm * tn * 4 + 2 * tn * 4)
    vmem_limit = int(min(max(footprint + (4 << 20), 32 << 20), 96 << 20))

    # Bytes include K-loop re-read factors (x re-read n_blocks times, w re-read
    # m_blocks times), not a single pass.
    cost = pl.CostEstimate(
        flops=2 * Mp * Kp * Np,
        transcendentals=0,
        bytes_accessed=(Mp * Kp * cbytes * n_blocks
                        + Kp * Np * cbytes * m_blocks
                        + Mp * Np * obytes),
    )

    compiler_params = pltpu.CompilerParams(
        dimension_semantics=("parallel", "parallel", "arbitrary"),
        vmem_limit_bytes=vmem_limit,
    )

    scratch = [pltpu.VMEM((tm, tn), jnp.float32)]

    if bias is None:
        out = pl.pallas_call(
            functools.partial(_conv1d_kernel_nobias, precision=precision),
            out_shape=jax.ShapeDtypeStruct((Mp, Np), out_dtype),
            grid_spec=pltpu.PrefetchScalarGridSpec(
                num_scalar_prefetch=0,
                grid=grid,
                in_specs=[x_spec, w_spec],
                out_specs=o_spec,
                scratch_shapes=scratch,
            ),
            compiler_params=compiler_params,
            cost_estimate=cost,
        )(x2, w2)
    else:
        # Bias stays f32 (no lossy downcast); added once to the f32 accumulator
        # at finalize.
        b2 = bias.reshape(1, nf).astype(jnp.float32)
        if Np != nf:
            b2 = jnp.pad(b2, ((0, 0), (0, Np - nf)))
        b_spec = pl.BlockSpec((1, tn), lambda i, j, k: (0, j))
        out = pl.pallas_call(
            functools.partial(_conv1d_kernel_bias, precision=precision),
            out_shape=jax.ShapeDtypeStruct((Mp, Np), out_dtype),
            grid_spec=pltpu.PrefetchScalarGridSpec(
                num_scalar_prefetch=0,
                grid=grid,
                in_specs=[x_spec, w_spec, b_spec],
                out_specs=o_spec,
                scratch_shapes=scratch,
            ),
            compiler_params=compiler_params,
            cost_estimate=cost,
        )(x2, w2, b2)

    out = out[:M, :nf]
    return out.reshape(*lead, nf)


if __name__ == "__main__":
    # Module config (synthetic, deterministic init — no checkpoint load).
    nx, nf = 32, 64          # hidden in / hidden out
    batch, seq = 2, 8        # flattened M = 16

    key = jax.random.PRNGKey(0)
    kx, kw = jax.random.split(key)

    # nn.init.normal_(weight, std=0.02); bias zeros (as in __init__).
    weight = (0.02 * jax.random.normal(kw, (nx, nf))).astype(jnp.float32)
    bias = jnp.zeros((nf,), dtype=jnp.float32)
    x = jax.random.normal(kx, (batch, seq, nx), dtype=jnp.float32)

    ref_f32 = jnp.matmul(x, weight) + bias

    # --- Default bf16 MXU path: compare vs bf16-operand reference (tight) and
    #     full-f32 reference (bf16-appropriate tolerance).
    y = jax.block_until_ready(conv1d(x, weight, bias))
    ref_bf16 = (jnp.dot(x.reshape(-1, nx).astype(jnp.bfloat16),
                        weight.astype(jnp.bfloat16),
                        preferred_element_type=jnp.float32)
                .reshape(batch, seq, nf) + bias).astype(x.dtype)
    assert y.shape == (batch, seq, nf)
    assert jnp.allclose(y, ref_bf16, atol=1e-4, rtol=1e-3), "mismatch (bf16 path)"
    assert jnp.allclose(y, ref_f32, atol=5e-3, rtol=5e-2), "mismatch vs f32 ref"

    # --- Explicit f32 / HIGHEST-precision path: tight tolerance.
    y32 = jax.block_until_ready(conv1d(x, weight, bias, compute_dtype=jnp.float32))
    assert jnp.allclose(y32, ref_f32, atol=1e-5, rtol=1e-5), "mismatch (f32 path)"

    # --- Bias-free path (Conv1D(bias=False)).
    y_nb = jax.block_until_ready(conv1d(x, weight, None, compute_dtype=jnp.float32))
    assert jnp.allclose(y_nb, jnp.matmul(x, weight), atol=1e-5, rtol=1e-5), \
        "mismatch vs reference (no bias)"

    print("KERNEL_OK")
</pallas_src>

<mosaic_0001>
module attributes {stable_mosaic.version = 11 : i64} {
  func.func @_conv1d_kernel_bias(%arg0: i32, %arg1: i32, %arg2: i32, %arg3: memref<16x128xbf16, #tpu.memory_space<vmem>>, %arg4: memref<128x128xbf16, #tpu.memory_space<vmem>>, %arg5: memref<1x128xf32, #tpu.memory_space<vmem>>, %arg6: memref<16x128xf32, #tpu.memory_space<vmem>>, %arg7: memref<16x128xf32, #tpu.memory_space<vmem>>) attributes {dimension_semantics = [#tpu.dimension_semantics<parallel>, #tpu.dimension_semantics<parallel>, #tpu.dimension_semantics<arbitrary>], iteration_bounds = array<i64: 1, 1, 1>, scalar_prefetch = 0 : i64, scratch_operands = 1 : i64, tpu.core_type = #tpu.core_type<tc>, window_params = [{transform_indices = @transform_0, window_bounds = array<i64: 16, 128>}, {transform_indices = @transform_1, window_bounds = array<i64: 128, 128>}, {transform_indices = @transform_2, window_bounds = array<i64: 1, 128>}, {transform_indices = @transform_3, window_bounds = array<i64: 16, 128>}]} {
    %c0 = arith.constant 0 : index
    %c0_0 = arith.constant 0 : index
    %0 = vector.load %arg3[%c0, %c0_0] : memref<16x128xbf16, #tpu.memory_space<vmem>>, vector<16x128xbf16>
    %c0_1 = arith.constant 0 : index
    %c0_2 = arith.constant 0 : index
    %1 = vector.load %arg4[%c0_1, %c0_2] : memref<128x128xbf16, #tpu.memory_space<vmem>>, vector<128x128xbf16>
    %cst = arith.constant dense<0.000000e+00> : vector<16x128xf32>
    %2 = tpu.matmul %0, %1, %cst {dimension_numbers = #tpu.dot_dimension_numbers<[1], [0], [0], [1], [0, 0, 1, 1], [], []>} : vector<16x128xbf16>, vector<128x128xbf16>, vector<16x128xf32> -> vector<16x128xf32>
    %c0_i32 = arith.constant 0 : i32
    %3 = arith.cmpi eq, %arg2, %c0_i32 : i32
    %4 = arith.extui %3 : i1 to i32
    %c0_i32_3 = arith.constant 0 : i32
    %5 = arith.cmpi ne, %4, %c0_i32_3 : i32
    scf.if %5 {
      %c0_8 = arith.constant 0 : index
      %c0_9 = arith.constant 0 : index
      %12 = vector.load %arg7[%c0_8, %c0_9] : memref<16x128xf32, #tpu.memory_space<vmem>>, vector<16x128xf32>
      tpu.vector_store %arg7[%c0_8, %c0_9], %2 {strides = array<i32>} : memref<16x128xf32, #tpu.memory_space<vmem>>, vector<16x128xf32>,
    } else {
    }
    %c0_i32_4 = arith.constant 0 : i32
    %6 = arith.cmpi ne, %arg2, %c0_i32_4 : i32
    %7 = arith.extui %6 : i1 to i32
    %c0_i32_5 = arith.constant 0 : i32
    %8 = arith.cmpi ne, %7, %c0_i32_5 : i32
    scf.if %8 {
      %c0_8 = arith.constant 0 : index
      %c0_9 = arith.constant 0 : index
      %12 = vector.load %arg7[%c0_8, %c0_9] : memref<16x128xf32, #tpu.memory_space<vmem>>, vector<16x128xf32>
      %13 = arith.addf %12, %2 : vector<16x128xf32>
      %c0_10 = arith.constant 0 : index
      %c0_11 = arith.constant 0 : index
      %14 = vector.load %arg7[%c0_10, %c0_11] : memref<16x128xf32, #tpu.memory_space<vmem>>, vector<16x128xf32>
      tpu.vector_store %arg7[%c0_10, %c0_11], %13 {strides = array<i32>} : memref<16x128xf32, #tpu.memory_space<vmem>>, vector<16x128xf32>,
    } else {
    }
    %c0_i32_6 = arith.constant 0 : i32
    %9 = arith.cmpi eq, %arg2, %c0_i32_6 : i32
    %10 = arith.extui %9 : i1 to i32
    %c0_i32_7 = arith.constant 0 : i32
    %11 = arith.cmpi ne, %10, %c0_i32_7 : i32
    scf.if %11 {
      %c0_8 = arith.constant 0 : index
      %c0_9 = arith.constant 0 : index
      %12 = vector.load %arg7[%c0_8, %c0_9] : memref<16x128xf32, #tpu.memory_space<vmem>>, vector<16x128xf32>
      %c0_10 = arith.constant 0 : index
      %c0_11 = arith.constant 0 : index
      %13 = vector.load %arg5[%c0_10, %c0_11] : memref<1x128xf32, #tpu.memory_space<vmem>>, vector<1x128xf32>
      %14 = vector.broadcast %13 : vector<1x128xf32> to vector<16x128xf32>
      %15 = arith.addf %12, %14 : vector<16x128xf32>
      %c0_12 = arith.constant 0 : index
      %c0_13 = arith.constant 0 : index
      %16 = vector.load %arg6[%c0_12, %c0_13] : memref<16x128xf32, #tpu.memory_space<vmem>>, vector<16x128xf32>
      tpu.vector_store %arg6[%c0_12, %c0_13], %15 {strides = array<i32>} : memref<16x128xf32, #tpu.memory_space<vmem>>, vector<16x128xf32>,
    } else {
    }
    return
  }
  func.func @transform_0(%arg0: i32, %arg1: i32, %arg2: i32) -> (i32, i32) {
    %c0_i32 = arith.constant 0 : i32
    return %arg0, %arg2 : i32, i32
  }
  func.func @transform_1(%arg0: i32, %arg1: i32, %arg2: i32) -> (i32, i32) {
    %c0_i32 = arith.constant 0 : i32
    return %arg2, %arg1 : i32, i32
  }
  func.func @transform_2(%arg0: i32, %arg1: i32, %arg2: i32) -> (i32, i32) {
    %c0_i32 = arith.constant 0 : i32
    %c0_i32_0 = arith.constant 0 : i32
    return %c0_i32, %arg1 : i32, i32
  }
  func.func @transform_3(%arg0: i32, %arg1: i32, %arg2: i32) -> (i32, i32) {
    %c0_i32 = arith.constant 0 : i32
    return %arg0, %arg1 : i32, i32
  }
}

</mosaic_0001>

<bundles_post_ra>
// kernel: tpu_custom_call.1
= control target key start
LH: loop header
LB: loop body
LE: loop exit
PB: predicated region body
PF: predicated region fallthrough
CT: control target
= control target key end

     0   :  { %8 = vsyncpa [#allocation4], 0  ;;  %s352_s0 = inlined_call_operand.hbm [shape: bf16[16,128], index: 0, kind: input, shape index: {}]   ;;  %s353_s1 = inlined_call_operand.hbm [shape: bf16[128,128], index: 1, kind: input, shape index: {}]   ;;  %s354_s2 = inlined_call_operand.vmem [shape: f32[1,128], index: 2, kind: input, shape index: {}]   ;;  %s355_s3 = inlined_call_operand.hbm [shape: f32[16,128], index: 3, kind: output, shape index: {}]  }
   0x1   :  { %9 = vsyncpa [#allocation7], 0 }
   0x2   :  { %10 = vsyncpa [#allocation5], 0  ;;  %s15_s14 = sshll.u32 %s352_s0, 4  ;;  %s313_s15 = smov [#allocation3]   ;;  %s16_s14 = int_to_ptr.hbm [resolvable:$true] %s15_s14 }
   0x3   :  { %s17_s16 = sshll.u32 %s313_s15, 4  ;;  %s28_s19 = sshll.u32 %s353_s1, 4  ;;  %s18_s16 = int_to_ptr.vmem [resolvable:$true] %s17_s16  ;;  %s29_s19 = int_to_ptr.hbm [resolvable:$true] %s28_s19 }
   0x4   :  { %s314_s20 = smov 64   ;;  %s315_s21 = smov 4  }
   0x5   :  { %23 = dma.hbm_to_vmem [thread:$0]  %s16_s14, 128, %s18_s16, [#allocation4], %s314_s20, %s314_s20, %s315_s21  }
   0x6   :  { %s316_s22 = smov [#allocation6]  }
   0x7   :  { %s30_s23 = sshll.u32 %s316_s22, 4  ;;  %s31_s23 = int_to_ptr.vmem [resolvable:$true] %s30_s23 }
   0x8   :  { %36 = dma.hbm_to_vmem [thread:$0]  %s29_s19, 1024, %s31_s23, [#allocation7], %s314_s20, %s314_s20, %s315_s21  }
   0x9   :  { %307 = dma.done.wait [#allocation4], 128  }
   0xa   :  { %308 = vsyncadd [#allocation4], 4294967168 }
   0xb   :  { %309 = dma.done.wait [#allocation7], 1024  }
   0xc   :  { %310 = vsyncadd [#allocation7], 4294966272  ;;  %v226_v0 = vld [vmem:[#allocation6 + $0x38] sm:$0xff]  ;;  %v225_v1 = vld [vmem:[#allocation6 + $0x30] sm:$0xff]  ;;  %s317_s24 = smov [#allocation8]   ;;  %s168_s28 = sshll.u32 %s355_s3, 4  ;;  %s169_s28 = int_to_ptr.hbm [resolvable:$true] %s168_s28 }
   0xd   :  { %119 = vmatpush.bf16.msra.mxu0 %v226_v0  ;;  %v224_v2 = vld [vmem:[#allocation6 + $0x28] sm:$0xff]  ;;  %v223_v3 = vld [vmem:[#allocation6 + $0x20] sm:$0xff]  ;;  %v222_v4 = vld [vmem:[#allocation6 + $0x18] sm:$0xff]  ;;  %s166_s25 = sshll.u32 %s317_s24, 4  ;;  %s318_s29 = smov 128   ;;  %s167_s25 = int_to_ptr.vmem [resolvable:$true] %s166_s25 }
   0xe   :  { %v221_v5 = vld [vmem:[#allocation6 + $0x10] sm:$0xff]  ;;  %v220_v6 = vld [vmem:[#allocation6 + $0x8] sm:$0xff]  ;;  %v219_v7 = vld [vmem:[#allocation6] sm:$0xff]  ;;  %s319_s30 = smov 8  }
   0xf   :  { %v218_v8 = vld [vmem:[#allocation3] sm:$0xff] }
  0x10   :  { %v234_v9 = vld [vmem:[%s354_s2] ss:$0 sm:$0xff] }
  0x11   :  { %120 = vmatpush.bf16.msra.mxu0 %v225_v1 }
  0x15   :  { %121 = vmatpush.bf16.msra.mxu0 %v224_v2 }
  0x19   :  { %122 = vmatpush.bf16.msra.mxu0 %v223_v3 }
  0x1d   :  { %123 = vmatpush.bf16.msra.mxu0 %v222_v4 }
  0x21   :  { %124 = vmatpush.bf16.msra.mxu0 %v221_v5 }
  0x25   :  { %125 = vmatpush.bf16.msra.mxu0 %v220_v6 }
  0x29   :  { %126 = vmatpush.bf16.msra.mxu0 %v219_v7 }
  0x2c   :  { %127 = vmatmul.bf16.vlgmr.msra.gmra.mxu0 %v218_v8 }
  0xa9   :  { %v128_v10 = vpop.f32.mrf.mxu0 }
  0xaa   :  { %v158_v11 = vadd.f32 %v234_v9, %v128_v10 }
  0xac   :  { %160 = vst [vmem:[#allocation8] sm:$0xff] %v158_v11 }
  0xb1   :  { %v130_v12 = vpop.f32.mrf.mxu0 }
  0xb2   :  { %v159_v13 = vadd.f32 %v234_v9, %v130_v12 }
  0xb4   :  { %161 = vst [vmem:[#allocation8 + $0x8] sm:$0xff] %v159_v13 }
  0xb5   :  { %174 = dma.vmem_to_hbm [thread:$0]  %s167_s25, 256, %s169_s28, [#allocation5], %s318_s29, %s318_s29, %s319_s30  }
  0xb6   :  { %311 = dma.done.wait [#allocation5], 256  }
  0xb7   :  { %312 = vsyncadd [#allocation5], 4294967040 }
  0xb8   :  { %179 = vsyncpa [#allocation4], 1 }
  0xb9   :  { %180 = vsyncpa [#allocation7], 1 }
  0xba   :  { %181 = vsyncpa [#allocation5], 1 }

</bundles_post_ra>
